<compile_context>
chip_gen: v6e
topology: v6e:2x2x1
jax: 0.10.0
libtpu: 0.0.40
codegen_flags: <defaults>
</compile_context>

<pallas_src>
import functools

import jax
import jax.numpy as jnp
from jax import lax
from jax.experimental import pallas as pl
from jax.experimental.pallas import tpu as pltpu


def _bn_pair_kernel(x_ref, g_ref, b_ref, o_ref, acc_ref, *,
                    inv_cnt, eps, pad_count):
    # x_ref : (N, BC, HWp)  one batch-half of one channel block
    # g_ref, b_ref : (1, BC, 1) affine params of the BatchNorm owning this half
    # acc_ref : (BC, HWp) f32 scratch accumulator
    n = x_ref.shape[0]
    unroll = True if n <= 16 else 8

    # ---- Pass 1: per-channel sum. Reduce over N first (cheap VPU adds into a
    # (BC, HWp) f32 partial), then ONE cross-lane (XLU) reduce over HW.
    acc_ref[...] = x_ref[0].astype(jnp.float32)

    def sum_body(i, carry):
        acc_ref[...] += x_ref[i].astype(jnp.float32)
        return carry

    lax.fori_loop(1, n, sum_body, 0, unroll=unroll)
    mean = jnp.sum(acc_ref[...], axis=1, keepdims=True) * inv_cnt      # (BC, 1)

    # ---- Pass 2: centered sum of squares (numerically stable), same order.
    # The centered value is only a per-slice transient; never materialized for
    # the whole block.
    c0 = x_ref[0].astype(jnp.float32) - mean
    acc_ref[...] = c0 * c0

    def sq_body(i, carry):
        c = x_ref[i].astype(jnp.float32) - mean
        acc_ref[...] += c * c
        return carry

    lax.fori_loop(1, n, sq_body, 0, unroll=unroll)
    sq = jnp.sum(acc_ref[...], axis=1, keepdims=True)                  # (BC, 1)
    if pad_count:
        # Zero-padded lanes contributed (0 - mean)^2 each; remove them.
        sq = sq - float(pad_count) * mean * mean
    var = sq * inv_cnt                                                 # biased

    # ---- Fold mean into the affine: o = x * scale + shift.
    g = g_ref[0].astype(jnp.float32)                                   # (BC, 1)
    b = b_ref[0].astype(jnp.float32)
    scale = lax.rsqrt(var + eps) * g                                   # EUP
    shift = b - mean * scale

    # ---- Pass 3: normalize + store one N slice at a time (lane-dense vst).
    def out_body(i, carry):
        xi = x_ref[i].astype(jnp.float32)
        o_ref[i] = (xi * scale + shift).astype(o_ref.dtype)
        return carry

    lax.fori_loop(0, n, out_body, 0, unroll=unroll)


def _vmem_capacity_bytes():
    """Per-core VMEM capacity; conservative 64 MiB (v7x) fallback."""
    try:
        info = pltpu.get_tpu_info()
        cap = getattr(info, "vmem_capacity_bytes", None)
        if cap:
            return int(cap)
    except Exception:
        pass
    return 64 * 1024 * 1024


def _live_bytes(n_half, bc, hw, in_item, out_item):
    """All live VMEM for one grid step (pipeline double-buffers included)."""
    io = 2 * n_half * bc * hw * (in_item + out_item)   # in + out, double-buffered
    acc = bc * hw * 4                                  # f32 scratch accumulator
    params = 2 * 2 * bc * 4 * 2                        # gamma/beta blocks (tiny)
    return io + acc + params


def _pick_channel_block(n_half, C, hw, in_item, out_item, sublane, budget):
    """Largest channel tile whose live VMEM fits the budget (no silent fallback)."""
    if _live_bytes(n_half, C, hw, in_item, out_item) <= budget:
        return C
    start = (C // sublane) * sublane
    for bc in range(start, 0, -sublane):
        if C % bc == 0 and _live_bytes(n_half, bc, hw, in_item, out_item) <= budget:
            return bc
    # TODO(synk): tiled-N two-pass variant needed for this size; refuse to
    # over-commit VMEM instead of failing inside Mosaic.
    raise ValueError(
        "batch_norm_pair: one half-batch channel block does not fit the VMEM "
        f"budget ({budget} bytes); a tiled-N two-pass kernel is required.")


def batch_norm_pair(x, gamma, beta, *, eps=1e-5):
    """Forward of the `batchNorm` module.

    x:     (L, C, H, W); first L//2 rows go through bn1, the rest through bn2.
    gamma: (2, C) affine weight  (row 0 = bn1, row 1 = bn2).
    beta:  (2, C) affine bias    (row 0 = bn1, row 1 = bn2).
    """
    L, C, H, W = x.shape
    assert L % 2 == 0, "batch dim must be even (two BatchNorm halves)"
    n = L // 2
    HW = H * W

    # Lane-dense layout: flatten spatial dims so the last dim is H*W.
    x3 = x.reshape(L, C, HW)

    # Pad the lane axis to a multiple of 128 when the relative overhead is
    # small (HW > 128); stats are corrected for the pad lanes in-kernel.
    if HW % 128 != 0 and HW > 128:
        HW_pad = int(128 * pl.cdiv(HW, 128))
        x3 = jnp.pad(x3, ((0, 0), (0, 0), (0, HW_pad - HW)))
    else:
        HW_pad = HW
    pad_count = n * (HW_pad - HW)   # zero-padded elements per channel per half

    g3 = gamma.reshape(2, C, 1)
    b3 = beta.reshape(2, C, 1)

    in_item = jnp.dtype(x.dtype).itemsize
    out_item = in_item
    sublane = 8 * max(1, 4 // in_item)          # 8 f32, 16 bf16, 32 int8/fp8

    vmem_cap = _vmem_capacity_bytes()
    budget = int(vmem_cap * 0.70)               # ~45 MiB on v7x, ~90 MiB on v5e/v6e
    block_c = _pick_channel_block(n, C, HW_pad, in_item, out_item, sublane, budget)
    live = _live_bytes(n, block_c, HW_pad, in_item, out_item)
    vmem_limit = int(min(vmem_cap - 4 * 1024 * 1024,
                         max(live + 8 * 1024 * 1024, 32 * 1024 * 1024)))

    kernel = functools.partial(
        _bn_pair_kernel,
        inv_cnt=1.0 / float(n * HW),            # true element count (pad excluded)
        eps=float(eps),
        pad_count=pad_count)

    out = pl.pallas_call(
        kernel,
        out_shape=jax.ShapeDtypeStruct((L, C, HW_pad), x.dtype),
        grid_spec=pltpu.PrefetchScalarGridSpec(
            num_scalar_prefetch=0,
            grid=(2, C // block_c),              # (batch-half, channel-block)
            in_specs=[
                pl.BlockSpec((n, block_c, HW_pad), lambda h, c: (h, c, 0)),
                pl.BlockSpec((1, block_c, 1), lambda h, c: (h, c, 0)),
                pl.BlockSpec((1, block_c, 1), lambda h, c: (h, c, 0)),
            ],
            out_specs=pl.BlockSpec((n, block_c, HW_pad), lambda h, c: (h, c, 0)),
            scratch_shapes=[pltpu.VMEM((block_c, HW_pad), jnp.float32)],
        ),
        compiler_params=pltpu.CompilerParams(
            dimension_semantics=("parallel", "parallel"),
            vmem_limit_bytes=vmem_limit,
        ),
    )(x3, g3, b3)

    if HW_pad != HW:
        out = out[..., :HW]
    return out.reshape(L, C, H, W)


def batch_norm_pair_ref(x, gamma, beta, *, eps=1e-5):
    # Pure-JAX reference mirroring the PyTorch forward (training-mode stats).
    L = x.shape[0]
    n = L // 2

    def bn(h, g, b):
        h = h.astype(jnp.float32)
        mean = jnp.mean(h, axis=(0, 2, 3), keepdims=True)
        var = jnp.mean((h - mean) ** 2, axis=(0, 2, 3), keepdims=True)
        y = (h - mean) * lax.rsqrt(var + eps)
        return y * g.reshape(1, -1, 1, 1) + b.reshape(1, -1, 1, 1)

    a = bn(x[:n], gamma[0], beta[0])
    d = bn(x[n:], gamma[1], beta[1])
    return jnp.concatenate([a, d], axis=0).astype(x.dtype)


if __name__ == "__main__":
    key = jax.random.PRNGKey(0)
    k1, k2, k3 = jax.random.split(key, 3)

    L, C, H, W = 4, 4, 16, 16                    # batch=4 -> two halves of 2
    x = jax.random.normal(k1, (L, C, H, W), dtype=jnp.float32)
    gamma = 1.0 + 0.1 * jax.random.normal(k2, (2, C), dtype=jnp.float32)
    beta = 0.1 * jax.random.normal(k3, (2, C), dtype=jnp.float32)

    out = batch_norm_pair(x, gamma, beta)
    out = jax.block_until_ready(out)

    ref = batch_norm_pair_ref(x, gamma, beta)
    assert out.shape == x.shape
    err = float(jnp.max(jnp.abs(out.astype(jnp.float32) - ref.astype(jnp.float32))))
    assert jnp.allclose(out, ref, atol=1e-4, rtol=1e-4), err
    print("KERNEL_OK")
</pallas_src>

<mosaic_0001>
module attributes {stable_mosaic.version = 11 : i64} {
  func.func @_bn_pair_kernel(%arg0: i32, %arg1: i32, %arg2: memref<2x4x256xf32, #tpu.memory_space<vmem>>, %arg3: memref<1x4x1xf32, #tpu.memory_space<vmem>>, %arg4: memref<1x4x1xf32, #tpu.memory_space<vmem>>, %arg5: memref<2x4x256xf32, #tpu.memory_space<vmem>>, %arg6: memref<4x256xf32, #tpu.memory_space<vmem>>) attributes {dimension_semantics = [#tpu.dimension_semantics<parallel>, #tpu.dimension_semantics<parallel>], iteration_bounds = array<i64: 2, 1>, scalar_prefetch = 0 : i64, scratch_operands = 1 : i64, tpu.core_type = #tpu.core_type<tc>, window_params = [{transform_indices = @transform_0, window_bounds = array<i64: 2, 4, 256>}, {transform_indices = @transform_1, window_bounds = array<i64: 1, 4, 1>}, {transform_indices = @transform_2, window_bounds = array<i64: 1, 4, 1>}, {transform_indices = @transform_3, window_bounds = array<i64: 2, 4, 256>}]} {
    %c0 = arith.constant 0 : index
    %c0_0 = arith.constant 0 : index
    %c0_1 = arith.constant 0 : index
    %0 = vector.load %arg2[%c0, %c0_0, %c0_1] : memref<2x4x256xf32, #tpu.memory_space<vmem>>, vector<1x4x256xf32>
    %1 = vector.shape_cast %0 : vector<1x4x256xf32> to vector<4x256xf32>
    %c0_2 = arith.constant 0 : index
    %c0_3 = arith.constant 0 : index
    %2 = vector.load %arg6[%c0_2, %c0_3] : memref<4x256xf32, #tpu.memory_space<vmem>>, vector<4x256xf32>
    tpu.vector_store %arg6[%c0_2, %c0_3], %1 {strides = array<i32>} : memref<4x256xf32, #tpu.memory_space<vmem>>, vector<4x256xf32>,
    %c1_i32 = arith.constant 1 : i32
    %c0_4 = arith.constant 0 : index
    %c0_5 = arith.constant 0 : index
    %3 = vector.load %arg6[%c0_4, %c0_5] : memref<4x256xf32, #tpu.memory_space<vmem>>, vector<4x256xf32>
    %4 = arith.index_cast %c1_i32 : i32 to index
    %c0_6 = arith.constant 0 : index
    %c0_7 = arith.constant 0 : index
    %5 = vector.load %arg2[%4, %c0_6, %c0_7] : memref<2x4x256xf32, #tpu.memory_space<vmem>>, vector<1x4x256xf32>
    %6 = vector.shape_cast %5 : vector<1x4x256xf32> to vector<4x256xf32>
    %7 = arith.addf %3, %6 : vector<4x256xf32>
    %c0_8 = arith.constant 0 : index
    %c0_9 = arith.constant 0 : index
    %8 = vector.load %arg6[%c0_8, %c0_9] : memref<4x256xf32, #tpu.memory_space<vmem>>, vector<4x256xf32>
    tpu.vector_store %arg6[%c0_8, %c0_9], %7 {strides = array<i32>} : memref<4x256xf32, #tpu.memory_space<vmem>>, vector<4x256xf32>,
    %c1_i32_10 = arith.constant 1 : i32
    %c0_11 = arith.constant 0 : index
    %c0_12 = arith.constant 0 : index
    %9 = vector.load %arg6[%c0_11, %c0_12] : memref<4x256xf32, #tpu.memory_space<vmem>>, vector<4x256xf32>
    %cst = arith.constant dense<0.000000e+00> : vector<4xf32>
    %10 = vector.multi_reduction <add>, %9, %cst [1] : vector<4x256xf32> to vector<4xf32>
    %11 = vector.shape_cast %10 : vector<4xf32> to vector<4x1xf32>
    %cst_13 = arith.constant 0.001953125 : f32
    %12 = vector.broadcast %cst_13 : f32 to vector<4x1xf32>
    %13 = arith.mulf %11, %12 : vector<4x1xf32>
    %c0_14 = arith.constant 0 : index
    %c0_15 = arith.constant 0 : index
    %c0_16 = arith.constant 0 : index
    %14 = vector.load %arg2[%c0_14, %c0_15, %c0_16] : memref<2x4x256xf32, #tpu.memory_space<vmem>>, vector<1x4x256xf32>
    %15 = vector.shape_cast %14 : vector<1x4x256xf32> to vector<4x256xf32>
    %16 = vector.broadcast %13 : vector<4x1xf32> to vector<4x256xf32>
    %17 = arith.subf %15, %16 : vector<4x256xf32>
    %18 = arith.mulf %17, %17 : vector<4x256xf32>
    %c0_17 = arith.constant 0 : index
    %c0_18 = arith.constant 0 : index
    %19 = vector.load %arg6[%c0_17, %c0_18] : memref<4x256xf32, #tpu.memory_space<vmem>>, vector<4x256xf32>
    tpu.vector_store %arg6[%c0_17, %c0_18], %18 {strides = array<i32>} : memref<4x256xf32, #tpu.memory_space<vmem>>, vector<4x256xf32>,
    %c1_i32_19 = arith.constant 1 : i32
    %20 = arith.index_cast %c1_i32_19 : i32 to index
    %c0_20 = arith.constant 0 : index
    %c0_21 = arith.constant 0 : index
    %21 = vector.load %arg2[%20, %c0_20, %c0_21] : memref<2x4x256xf32, #tpu.memory_space<vmem>>, vector<1x4x256xf32>
    %22 = vector.shape_cast %21 : vector<1x4x256xf32> to vector<4x256xf32>
    %23 = vector.broadcast %13 : vector<4x1xf32> to vector<4x256xf32>
    %24 = arith.subf %22, %23 : vector<4x256xf32>
    %c0_22 = arith.constant 0 : index
    %c0_23 = arith.constant 0 : index
    %25 = vector.load %arg6[%c0_22, %c0_23] : memref<4x256xf32, #tpu.memory_space<vmem>>, vector<4x256xf32>
    %26 = arith.mulf %24, %24 : vector<4x256xf32>
    %27 = arith.addf %25, %26 : vector<4x256xf32>
    %c0_24 = arith.constant 0 : index
    %c0_25 = arith.constant 0 : index
    %28 = vector.load %arg6[%c0_24, %c0_25] : memref<4x256xf32, #tpu.memory_space<vmem>>, vector<4x256xf32>
    tpu.vector_store %arg6[%c0_24, %c0_25], %27 {strides = array<i32>} : memref<4x256xf32, #tpu.memory_space<vmem>>, vector<4x256xf32>,
    %c1_i32_26 = arith.constant 1 : i32
    %c0_27 = arith.constant 0 : index
    %c0_28 = arith.constant 0 : index
    %29 = vector.load %arg6[%c0_27, %c0_28] : memref<4x256xf32, #tpu.memory_space<vmem>>, vector<4x256xf32>
    %cst_29 = arith.constant dense<0.000000e+00> : vector<4xf32>
    %30 = vector.multi_reduction <add>, %29, %cst_29 [1] : vector<4x256xf32> to vector<4xf32>
    %31 = vector.shape_cast %30 : vector<4xf32> to vector<4x1xf32>
    %cst_30 = arith.constant 0.001953125 : f32
    %32 = vector.broadcast %cst_30 : f32 to vector<4x1xf32>
    %33 = arith.mulf %31, %32 : vector<4x1xf32>
    %c0_31 = arith.constant 0 : index
    %c0_32 = arith.constant 0 : index
    %c0_33 = arith.constant 0 : index
    %34 = vector.load %arg3[%c0_31, %c0_32, %c0_33] : memref<1x4x1xf32, #tpu.memory_space<vmem>>, vector<1x4x1xf32>
    %35 = vector.shape_cast %34 : vector<1x4x1xf32> to vector<4x1xf32>
    %c0_34 = arith.constant 0 : index
    %c0_35 = arith.constant 0 : index
    %c0_36 = arith.constant 0 : index
    %36 = vector.load %arg4[%c0_34, %c0_35, %c0_36] : memref<1x4x1xf32, #tpu.memory_space<vmem>>, vector<1x4x1xf32>
    %37 = vector.shape_cast %36 : vector<1x4x1xf32> to vector<4x1xf32>
    %cst_37 = arith.constant 9.99999974E-6 : f32
    %38 = vector.broadcast %cst_37 : f32 to vector<4x1xf32>
    %39 = arith.addf %33, %38 : vector<4x1xf32>
    %40 = math.rsqrt %39 : vector<4x1xf32>
    %41 = arith.mulf %40, %35 : vector<4x1xf32>
    %42 = arith.mulf %13, %41 : vector<4x1xf32>
    %43 = arith.subf %37, %42 : vector<4x1xf32>
    %c0_i32 = arith.constant 0 : i32
    %44 = arith.index_cast %c0_i32 : i32 to index
    %c0_38 = arith.constant 0 : index
    %c0_39 = arith.constant 0 : index
    %45 = vector.load %arg2[%44, %c0_38, %c0_39] : memref<2x4x256xf32, #tpu.memory_space<vmem>>, vector<1x4x256xf32>
    %46 = vector.shape_cast %45 : vector<1x4x256xf32> to vector<4x256xf32>
    %47 = vector.broadcast %41 : vector<4x1xf32> to vector<4x256xf32>
    %48 = arith.mulf %46, %47 : vector<4x256xf32>
    %49 = vector.broadcast %43 : vector<4x1xf32> to vector<4x256xf32>
    %50 = arith.addf %48, %49 : vector<4x256xf32>
    %51 = arith.index_cast %c0_i32 : i32 to index
    %c0_40 = arith.constant 0 : index
    %c0_41 = arith.constant 0 : index
    %52 = vector.load %arg5[%51, %c0_40, %c0_41] : memref<2x4x256xf32, #tpu.memory_space<vmem>>, vector<1x4x256xf32>
    %53 = vector.shape_cast %52 : vector<1x4x256xf32> to vector<4x256xf32>
    %54 = vector.shape_cast %50 : vector<4x256xf32> to vector<1x4x256xf32>
    tpu.vector_store %arg5[%51, %c0_40, %c0_41], %54 {strides = array<i32>} : memref<2x4x256xf32, #tpu.memory_space<vmem>>, vector<1x4x256xf32>,
    %c1_i32_42 = arith.constant 1 : i32
    %55 = arith.index_cast %c1_i32_42 : i32 to index
    %c0_43 = arith.constant 0 : index
    %c0_44 = arith.constant 0 : index
    %56 = vector.load %arg2[%55, %c0_43, %c0_44] : memref<2x4x256xf32, #tpu.memory_space<vmem>>, vector<1x4x256xf32>
    %57 = vector.shape_cast %56 : vector<1x4x256xf32> to vector<4x256xf32>
    %58 = vector.broadcast %41 : vector<4x1xf32> to vector<4x256xf32>
    %59 = arith.mulf %57, %58 : vector<4x256xf32>
    %60 = vector.broadcast %43 : vector<4x1xf32> to vector<4x256xf32>
    %61 = arith.addf %59, %60 : vector<4x256xf32>
    %62 = arith.index_cast %c1_i32_42 : i32 to index
    %c0_45 = arith.constant 0 : index
    %c0_46 = arith.constant 0 : index
    %63 = vector.load %arg5[%62, %c0_45, %c0_46] : memref<2x4x256xf32, #tpu.memory_space<vmem>>, vector<1x4x256xf32>
    %64 = vector.shape_cast %63 : vector<1x4x256xf32> to vector<4x256xf32>
    %65 = vector.shape_cast %61 : vector<4x256xf32> to vector<1x4x256xf32>
    tpu.vector_store %arg5[%62, %c0_45, %c0_46], %65 {strides = array<i32>} : memref<2x4x256xf32, #tpu.memory_space<vmem>>, vector<1x4x256xf32>,
    %c2_i32 = arith.constant 2 : i32
    return
  }
  func.func @transform_0(%arg0: i32, %arg1: i32) -> (i32, i32, i32) {
    %c0_i32 = arith.constant 0 : i32
    %c0_i32_0 = arith.constant 0 : i32
    return %arg0, %arg1, %c0_i32 : i32, i32, i32
  }
  func.func @transform_1(%arg0: i32, %arg1: i32) -> (i32, i32, i32) {
    %c0_i32 = arith.constant 0 : i32
    %c0_i32_0 = arith.constant 0 : i32
    return %arg0, %arg1, %c0_i32 : i32, i32, i32
  }
  func.func @transform_2(%arg0: i32, %arg1: i32) -> (i32, i32, i32) {
    %c0_i32 = arith.constant 0 : i32
    %c0_i32_0 = arith.constant 0 : i32
    return %arg0, %arg1, %c0_i32 : i32, i32, i32
  }
  func.func @transform_3(%arg0: i32, %arg1: i32) -> (i32, i32, i32) {
    %c0_i32 = arith.constant 0 : i32
    %c0_i32_0 = arith.constant 0 : i32
    return %arg0, %arg1, %c0_i32 : i32, i32, i32
  }
}

</mosaic_0001>

<bundles_post_ra>
// kernel: tpu_custom_call.1
= control target key start
LH: loop header
LB: loop body
LE: loop exit
PB: predicated region body
PF: predicated region fallthrough
CT: control target
= control target key end

     0   :  { %8 = vsyncpa [#allocation4], 0  ;;  %s886_s0 = inlined_call_operand.hbm [shape: f32[4,4,256], index: 0, kind: input, shape index: {}]   ;;  %s887_s1 = inlined_call_operand.vmem [shape: f32[2,4,1], index: 1, kind: input, shape index: {}]   ;;  %s888_s2 = inlined_call_operand.vmem [shape: f32[2,4,1], index: 2, kind: input, shape index: {}]   ;;  %s889_s3 = inlined_call_operand.hbm [shape: f32[4,4,256], index: 3, kind: output, shape index: {}]  }
   0x1   :  { %10 = vsyncpa [#allocation4 + $0x1], 0 }
   0x2   :  { %11 = vsyncpa [#allocation5], 0 }
   0x3   :  { %13 = vsyncpa [#allocation5 + $0x1], 0  ;;  %s724_s12 = smov 0   ;;  %s726_s13 = smov 0  }
   0x4   :  { %s728_s14 = smov 0   ;;  %s730_s15 = smov 0  }
   0x5   :  { %s732_s16 = smov 0   ;;  %s734_s17 = smov 0  }
   0x6 LB: > { %s487_s18 = sadd.s32 4294967295, %s694_s17   ;;  %s488_s19 = sadd.s32 4294967294, %s694_s17   ;;  %s694_s17 = sphi %s734_s17, %s19_s17   ;;  %s690_s16 = sphi %s732_s16, %s900_s16   ;;  %s686_s15 = sphi %s730_s15, %s899_s15   ;;  %s682_s14 = sphi %s728_s14, %s898_s14   ;;  %s678_s13 = sphi %s726_s13, %s897_s13   ;;  %s674_s12 = sphi %s724_s12, %s896_s12  }
   0x7   : > { %s31_s20 = sadd.s32 1, %s690_s16  ;;  %s40_s21 = sadd.s32 1, %s682_s14 }
   0x8   : > { %p33_p0 = scmp.ge.s32.totalorder %s31_s20, 2  ;;  %p47_p1 = scmp.ne.s32.totalorder %s682_s14, %s678_s13 }
   0x9   : > { %p48_p2 = scmp.eq.s32.totalorder %s694_s17, 0  ;;  %p53_p3 = scmp.ne.s32.totalorder %s678_s13, %s674_s12 }
   0xa   : > { %s902_s20 = smov (%p33_p0, %s31_s20), 0  ;;  %p54_p5 = scmp.eq.s32.totalorder %s487_s18, 0 }
   0xb   : > { %p765_p4 = por %p48_p2, %p47_p1  ;;  %s35_s23 = ssub.s32 %s690_s16, %s902_s20 }
   0xc   : > { %p135_p6 = scmp.eq.s32.totalorder %s487_s18, 1  ;;  %p38_p7 = scmp.eq.s32.totalorder %s35_s23, 0 }
   0xd   : > { %p771_p8 = por %p54_p5, %p53_p3  ;;  %p141_p10 = scmp.eq.s32.totalorder %s488_s19, 1 }
   0xe   : > { %p775_p9 = por %p135_p6, %p47_p1  ;;  %p526_p13 = scmp.lt.s32.totalorder %s694_s17, 2 }
   0xf   : > { %s780_s26 = scalar_select %p38_p7, %s682_s14, %s40_s21  }
  0x10   : > { %p782_p11 = por %p141_p10, %p53_p3  ;;  %s161_s28 = sand.u32 1, %s682_s14  }
  0x11   : > { %s491_s29 = sshll.u32 %s161_s28, 4  ;;  %s511_s30 = sshll.u32 %s690_s16, 8 }
  0x12   : > { %s174_s6 = scalar_lea.hbm %s886_s0, %s511_s30  ;;  %s165_s7 = scalar_lea.vmem [#allocation3], %s491_s29 }
  0x13   : > { %s175_s8 = sshll.u32 %s165_s7, 4  ;;  %p795_p0 = pnand %p526_p13, %p765_p4  ;;  %s176_s8 = int_to_ptr.vmem [resolvable:$true] %s175_s8 }
  0x14   : > { %p495_p1 = scmp.ge.s32.totalorder %s694_s17, 1  ;;  %s162_s10 = scalar_lea.sflag [#allocation4], %s161_s28 }
  0x15   : > { %p588_p2 = pneg %p795_p0  ;;  %s599_s11 = scalar_lea.vmem %s176_s8, 256 }
  0x16   : > { %p600_p3 = scmp.ne.s32.totalorder %s176_s8, %s599_s11  ;;  %s696_s18 = smov [#allocation3]  }
  0x17   : > { %s604_s19 = sshll.u32 %s696_s18, 4  ;;  %s605_s19 = int_to_ptr.vmem [resolvable:$false] %s604_s19 }
  0x18   : > { %p602_p5 = pnand %p600_p3, %p588_p2  ;;  %s606_s21 = scalar_lea.vmem %s605_s19, 512 }
  0x19   : > { %p607_p7 = scmp.lt.s32.totalorder %s176_s8, %s605_s19  ;;  %p608_p10 = scmp.lt.s32.totalorder %s606_s21, %s599_s11 }
  0x1a   : > { %p603_p6 = pneg %p602_p5 }
  0x1b   : > { %p609_p12 = por %p608_p10, %p607_p7 }
  0x1d   : > { %p610_p4 = pnand %p609_p12, %p603_p6 }
  0x1f   : > { %613 = shalt.err (!%p610_p4)
}
  0x20   : > { %s697_s22 = smov 128   ;;  %s698_s23 = smov 8  }
  0x21   : > { %521 = dma.hbm_to_vmem [thread:$0]  (!%p795_p0), %s174_s6, 256, %s176_s8, %s162_s10, %s697_s22, %s697_s22, %s698_s23  }
  0x22   : > { %p203_p13 = scmp.lt.s32.totalorder %s694_s17, 3 }
  0x24   : > { %p204_p2 = pnand %p495_p1, %p203_p13 }
  0x25   : > { %s808_s28 = sand.u32 (!%p204_p2), 1, %s678_s13  }
  0x26   : > { %207 = sbr.rel (%p204_p2) target bundleno = 509 (0x1fd), region = 32  ;;  %s496_s29 = sshll.u32 (!%p204_p2), %s808_s28, 4 }
  0x27   : > { %s210_s30 = scalar_lea.sflag (!%p204_p2), [#allocation4], %s808_s28  ;;  %s213_s4 = scalar_lea.vmem (!%p204_p2), [#allocation3], %s496_s29 }
  0x2b   : > { %665 = dma.done.wait (%p771_p8), %s210_s30, 256  }
  0x2c   : > { %667 = vsyncadd (%p771_p8), %s210_s30, 4294967040  ;;  %v266_v0 = vld [vmem:[%s213_s4] sm:$0xff]  ;;  %v500_v1 = vld [vmem:[%s213_s4 + $0x8] sm:$0xff]  ;;  %vm277_vm0 = vcmask 1043456   ;;  %v699_v7 = vmov 839922192   ;;  %v289_v9 = vlaneseq }
  0x2d   : > { %v271_v2 = vadd.f32 %v500_v1, %v266_v0  ;;  %v287_v8 = vunpack.c.l.s4 %v699_v7  ;;  %v700_v25 = vmov 0   ;;  %p251_p8 = scmp.lt.s32.totalorder %s686_s15, 1  ;;  %s249_s18 = scalar_lea.vmem [#allocation6], %s496_s29 }
  0x2e   : > { %v290_v11 = vshrl.u32 %v289_v9, 7  ;;  %582 = vset.pattern.permute.xlu1 %v700_v25  ;;  %583 = vset.pattern.permute.xlu0 %v700_v25  ;;  %s370_s19 = sshll.u32 %s249_s18, 4  ;;  %s513_s21 = sshll.u32 %s686_s15, 8  ;;  %s833_s19 = int_to_ptr.vmem [resolvable:$true] %s370_s19 }
  0x2f   : > { %v275_v3 = vcombine.high %v271_v2, %v271_v2  ;;  %v278_v4 = vsel %vm277_vm0, %v271_v2, 0.0  ;;  %v288_v10 = vunpack.c.0.s8 %v287_v8  ;;  %s252_s24 = scalar_select %p251_p8, %s686_s15, 1 }
  0x30   : > { %s838_s30 = scalar_lea.hbm %s889_s3, %s513_s21  ;;  %s354_s29 = scalar_lea.sflag [#allocation5], %s808_s28 }
  0x31   : > { %v279_v5 = vsel %vm277_vm0, %v275_v3, 0.0  ;;  %v291_v12 = vsub.s32 %v288_v10, %v290_v11  ;;  %s498_s5 = sshll.u32 %s252_s24, 2  ;;  %s614_s15 = scalar_lea.vmem %s833_s19, 256 }
  0x32   : > { %v280_v6 = vadd.f32 %v279_v5, %v278_v4  ;;  %s257_s8 = scalar_lea.vmem %s887_s1, %s498_s5  ;;  %s264_s11 = scalar_lea.vmem %s888_s2, %s498_s5 }
  0x33   : > { %v313_v29 = vld [vmem:[%s257_s8] sm:$0xf]  ;;  %p615_p12 = scmp.ne.s32.totalorder %s833_s19, %s614_s15  ;;  %s701_s4 = smov [#allocation6]  }
  0x34   : > { %281 = vadd.xlane.f32.xlu0 %v280_v6  ;;  %v314_v32 = vld [vmem:[%s264_s11] sm:$0xf]  ;;  %s618_s24 = sshll.u32 %s701_s4, 4  ;;  %s619_s24 = int_to_ptr.vmem [resolvable:$false] %s618_s24 }
  0x35   : > { %p616_p0 = pnand %p615_p12, %p775_p9  ;;  %s620_s5 = scalar_lea.vmem %s619_s24, 512 }
  0x36   : > { %p621_p3 = scmp.lt.s32.totalorder %s833_s19, %s619_s24  ;;  %p622_p5 = scmp.lt.s32.totalorder %s620_s5, %s614_s15 }
  0x37   : > { %p617_p1 = pneg %p616_p0 }
  0x38   : > { %p623_p6 = por %p622_p5, %p621_p3 }
  0x3a   : > { %p624_p7 = pnand %p623_p6, %p617_p1 }
  0xbd   : > { %v282_v13 = vpop.xlane.xlu0 %281 }
  0xbe   : > { %v283_v14 = vmul.f32 0.001953125, %v282_v13 }
  0xc0   : > { %v292_v15 = vrot.slane %v283_v14, %v291_v12 }
  0xc2   : > { %v294_v16 = vsub.f32 %v266_v0, %v292_v15  ;;  %v298_v17 = vsub.f32 %v500_v1, %v292_v15 }
  0xc4   : > { %v295_v18 = vmul.f32 %v294_v16, %v294_v16  ;;  %v300_v19 = vmul.f32 %v298_v17, %v298_v17 }
  0xc6   : > { %v301_v20 = vadd.f32 %v300_v19, %v295_v18 }
  0xc8   : > { %v305_v21 = vcombine.high %v301_v20, %v301_v20  ;;  %v307_v22 = vsel %vm277_vm0, %v301_v20, 0.0 }
  0xca   : > { %v308_v23 = vsel %vm277_vm0, %v305_v21, 0.0 }
  0xcb   : > { %v309_v24 = vadd.f32 %v308_v23, %v307_v22 }
  0xcd   : > { %310 = vadd.xlane.f32.xlu0 %v309_v24 }
 0x156   : > { %v311_v26 = vpop.xlane.xlu0 %310 }
 0x157   : > { %v312_v27 = vmul.f32 0.001953125, %v311_v26 }
 0x159   : > { %v315_v28 = vadd.f32 1e-05, %v312_v27 }
 0x15b   : > { %584 = vrsqrt.f32 %v315_v28 }
 0x168   : > { %v585_v30 = vpop.eup %584 }
 0x169   : > { %v317_v31 = vmul.f32 %v585_v30, %v313_v29 }
 0x16b   : > { %323 = vperm.xlu1 %582, %v317_v31   ;;  %v318_v33 = vmul.f32 %v317_v31, %v283_v14 }
 0x16d   : > { %v319_v34 = vsub.f32 %v314_v32, %v318_v33 }
 0x16f   : > { %336 = vperm.xlu1 %582, %v319_v34  }
 0x1e6   : > { %v324_v35 = vpop.permute.xlu1 %323 }
 0x1e7   : > { %v331_v36 = vrot.slane %v324_v35, %v291_v12 }
 0x1e9   : > { %v333_v38 = vmul.f32 %v331_v36, %v266_v0  ;;  %v349_v39 = vmul.f32 %v500_v1, %v331_v36 }
 0x1ea   : > { %v337_v37 = vpop.permute.xlu1 %336 }
 0x1eb   : > { %v344_v40 = vrot.slane %v337_v37, %v291_v12 }
 0x1ed   : > { %v346_v41 = vadd.f32 %v344_v40, %v333_v38  ;;  %v350_v42 = vadd.f32 %v349_v39, %v344_v40 }
 0x1ef   : > { %347 = vst [vmem:[%s249_s18] sm:$0xff] %v346_v41  ;;  %503 = vst [vmem:[%s249_s18 + $0x8] sm:$0xff] %v350_v42 }
 0x1f0   : > { %627 = shalt.err (!%p624_p7)
}
 0x1f1   : > { %s628_s6 = scalar_lea.hbm %s838_s30, 256  ;;  %s632_s9 = scalar_lea.hbm %s889_s3, 512 }
 0x1f2   : > { %p629_p10 = scmp.ne.s32.totalorder %s838_s30, %s628_s6  ;;  %p633_p2 = scmp.lt.s32.totalorder %s838_s30, %s889_s3 }
 0x1f3   : > { %p634_p8 = scmp.lt.s32.totalorder %s632_s9, %s628_s6 }
 0x1f4   : > { %p630_p4 = pnand %p629_p10, %p775_p9 }
 0x1f5   : > { %p635_p12 = por %p634_p8, %p633_p2 }
 0x1f6   : > { %p631_p13 = pneg %p630_p4 }
 0x1f8   : > { %p636_p0 = pnand %p635_p12, %p631_p13 }
 0x1fa   : > { %639 = shalt.err (!%p636_p0)
}
 0x1fb   : > { %s702_s18 = smov 128   ;;  %s703_s21 = smov 8  }
 0x1fc   : > { %516 = dma.vmem_to_hbm [thread:$0]  (%p775_p9), %s833_s19, 256, %s838_s30, %s354_s29, %s702_s18, %s702_s18, %s703_s21  }
 0x1fd PF: > { %s385_s22 = sand.u32 1, %s674_s12   ;;  %p895_p1 = scmp.ge.s32.totalorder %s694_s17, 2 }
 0x1fe   : > { %s386_s23 = scalar_lea.sflag [#allocation5], %s385_s22 }
 0x1ff   : > { %p523_p3 = pnand %p895_p1, %p782_p11 }
 0x201   : > { %p524_p5 = pneg %p523_p3 }
 0x203   : > { %669 = dma.done.wait (%p524_p5), %s386_s23, 256  }
 0x204   : > { %671 = vsyncadd (%p524_p5), %s386_s23, 4294967040  ;;  %s19_s17 = sadd.s32 1, %s694_s17   ;;  %s896_s12 = smov %s678_s13 }
 0x205   : > { %p16_p6 = scmp.ge.s32.totalorder %s19_s17, 4   ;;  %s897_s13 = smov %s682_s14 }
 0x206   : > { %s898_s14 = smov %s780_s26  ;;  %s899_s15 = smov %s690_s16 }
 0x207   : > { %s900_s16 = smov %s902_s20  ;;  %18 = sbr.rel (!%p16_p6) target bundleno = 6 (0x6), region = 85 }
 0x20c   :  { %391 = vsyncpa [#allocation4], 1 }
 0x20d   :  { %393 = vsyncpa [#allocation4 + $0x1], 1 }
 0x20e   :  { %394 = vsyncpa [#allocation5], 1 }
 0x20f   :  { %396 = vsyncpa [#allocation5 + $0x1], 1 }

</bundles_post_ra>
